<compile_context>
chip_gen: v7x
topology: tpu7x:2x2x1
jax: 0.10.0
libtpu: 0.0.40
codegen_flags: <defaults>
</compile_context>

<pallas_src>
import jax
import jax.numpy as jnp
from jax import lax
from jax.experimental import pallas as pl
from jax.experimental.pallas import tpu as pltpu
import numpy as np

LINEAR_SIZE = 256          # l_size used by the generator that owns this block
BATCH = 16                 # multiple of the 16-row bf16 sublane tile
NUM_STAGES = 2             # (Linear -> BN -> LeakyReLU) x 2
BN_EPS = 1e-5
LRELU_SLOPE = 0.01         # nn.LeakyReLU default negative_slope


# ------------------------------ Pallas kernel --------------------------------
def linear_block_kernel(x_ref, w_ref, bn_ref, o_ref):
    """One grid step == one (Linear -> BN(train) -> LeakyReLU) stage.

    x_ref  : (N, L)     f32   input activations (consumed at stage 0 only)
    w_ref  : (1, L, L)  bf16  this stage's weight, stored transposed (y = h @ W)
    bn_ref : (1, 8, L)  f32   row 0 = gamma, row 1 = beta, rows 2..7 padding
    o_ref  : (N, L)     f32   output block; constant index_map keeps it
                              VMEM-resident, so it doubles as the activation
                              carry between the two stages.
    """
    i = pl.program_id(0)

    # Stage 0 seeds the resident carry with the kernel input.
    @pl.when(i == 0)
    def _():
        o_ref[...] = x_ref[...]

    h = o_ref[...]

    # Linear (bias-free): bf16 MXU operands, f32 accumulation.  The nn.Linear
    # bias is mathematically dead under training-mode BatchNorm (cancelled by
    # the per-feature mean subtraction), so it is not materialized at all.
    y = jnp.dot(h.astype(jnp.bfloat16), w_ref[0],
                preferred_element_type=jnp.float32)

    # BatchNorm1d, training mode: per-feature batch stats, biased variance.
    mu = jnp.mean(y, axis=0, keepdims=True)
    d = y - mu
    var = jnp.mean(d * d, axis=0, keepdims=True)
    gamma = bn_ref[0, 0:1, :]
    beta = bn_ref[0, 1:2, :]

    # Fold scale/shift on the (1, L) row, then one mul + one add over the
    # (N, L) tile with LeakyReLU fused into the same traversal.
    s = gamma * lax.rsqrt(var + BN_EPS)            # single EUP rsqrt
    t = beta - mu * s
    yn = y * s + t
    o_ref[...] = jnp.where(yn >= 0, yn, LRELU_SLOPE * yn)


# --------------------------------- wrapper ------------------------------------
def linear_block_forward(x, params):
    n, l = x.shape
    w, bn = params["w"], params["bn"]
    num_stages = w.shape[0]

    # Advisory cost hints for XLA scheduling around the custom call.
    flops = 2 * num_stages * n * l * l + 10 * num_stages * n * l
    transcendentals = num_stages * l               # one rsqrt per feature per BN
    bytes_accessed = (2 * 4 * n * l                # x in + y out (f32)
                      + num_stages * 2 * l * l     # bf16 weights
                      + num_stages * 4 * 8 * l)    # BN param slab

    return pl.pallas_call(
        linear_block_kernel,
        out_shape=jax.ShapeDtypeStruct((n, l), jnp.float32),
        grid_spec=pltpu.PrefetchScalarGridSpec(
            num_scalar_prefetch=0,
            grid=(num_stages,),
            in_specs=[
                pl.BlockSpec((n, l), lambda i: (0, 0)),        # x (revisited)
                pl.BlockSpec((1, l, l), lambda i: (i, 0, 0)),  # stage weight
                pl.BlockSpec((1, 8, l), lambda i: (i, 0, 0)),  # stage BN slab
            ],
            out_specs=pl.BlockSpec((n, l), lambda i: (0, 0)),  # resident carry
        ),
        compiler_params=pltpu.CompilerParams(
            dimension_semantics=("arbitrary",),     # sequential stage chain
            vmem_limit_bytes=4 * 1024 * 1024),
        cost_estimate=pl.CostEstimate(flops=flops,
                                      transcendentals=transcendentals,
                                      bytes_accessed=bytes_accessed),
    )(x, w, bn)


# ------------------------------ parameter init --------------------------------
def init_params(key, l_size):
    # PyTorch nn.Linear default weight init: U(-1/sqrt(fan_in), 1/sqrt(fan_in)).
    # Biases are omitted (exactly cancelled by training-mode BatchNorm).
    k1, k2 = jax.random.split(key)
    bound = 1.0 / np.sqrt(l_size)
    w1 = jax.random.uniform(k1, (l_size, l_size), jnp.float32, -bound, bound)
    w2 = jax.random.uniform(k2, (l_size, l_size), jnp.float32, -bound, bound)
    w = jnp.stack([w1, w2]).astype(jnp.bfloat16)            # (2, L, L) bf16

    bn = jnp.zeros((NUM_STAGES, 8, l_size), jnp.float32)    # (2, 8, L) slab
    bn = bn.at[:, 0, :].set(1.0)                            # gamma = 1, beta = 0
    return {"w": w, "bn": bn}


# ------------------------------ pure-JAX reference -----------------------------
def linear_block_ref(x, params):
    """Reference with the same bf16-operand / f32-accumulation matmul path."""
    h = x
    for i in range(params["w"].shape[0]):
        y = jnp.dot(h.astype(jnp.bfloat16), params["w"][i],
                    preferred_element_type=jnp.float32)
        mu = jnp.mean(y, axis=0, keepdims=True)
        var = jnp.mean((y - mu) ** 2, axis=0, keepdims=True)
        gamma = params["bn"][i, 0:1, :]
        beta = params["bn"][i, 1:2, :]
        yn = (y - mu) * lax.rsqrt(var + BN_EPS) * gamma + beta
        h = jnp.where(yn >= 0, yn, LRELU_SLOPE * yn)
    return h


# ----------------------------------- main --------------------------------------
if __name__ == "__main__":
    key = jax.random.PRNGKey(0)
    k_x, k_p = jax.random.split(key)

    x = jax.random.normal(k_x, (BATCH, LINEAR_SIZE), jnp.float32)
    params = init_params(k_p, LINEAR_SIZE)

    out = jax.jit(linear_block_forward)(x, params)
    jax.block_until_ready(out)

    ref = linear_block_ref(x, params)

    assert out.shape == (BATCH, LINEAR_SIZE), out.shape
    assert out.dtype == jnp.float32, out.dtype
    assert bool(jnp.all(jnp.isfinite(out)))
    max_err = float(jnp.max(jnp.abs(out - ref)))
    assert max_err < 5e-2, f"max abs error vs reference: {max_err}"
    print("KERNEL_OK")
</pallas_src>

<mosaic_0001>
module attributes {stable_mosaic.version = 11 : i64} {
  func.func @linear_block_kernel(%arg0: i32, %arg1: memref<16x256xf32, #tpu.memory_space<vmem>>, %arg2: memref<1x256x256xbf16, #tpu.memory_space<vmem>>, %arg3: memref<1x8x256xf32, #tpu.memory_space<vmem>>, %arg4: memref<16x256xf32, #tpu.memory_space<vmem>>) attributes {dimension_semantics = [#tpu.dimension_semantics<arbitrary>], iteration_bounds = array<i64: 2>, scalar_prefetch = 0 : i64, scratch_operands = 0 : i64, tpu.core_type = #tpu.core_type<tc>, window_params = [{pipeline_mode = #tpu.pipeline_mode<synchronous>, transform_indices = @transform_0, window_bounds = array<i64: 16, 256>}, {transform_indices = @transform_1, window_bounds = array<i64: 1, 256, 256>}, {transform_indices = @transform_2, window_bounds = array<i64: 1, 8, 256>}, {pipeline_mode = #tpu.pipeline_mode<synchronous>, transform_indices = @transform_3, window_bounds = array<i64: 16, 256>}]} {
    %c0_i32 = arith.constant 0 : i32
    %0 = arith.cmpi eq, %arg0, %c0_i32 : i32
    %1 = arith.extui %0 : i1 to i32
    %c0_i32_0 = arith.constant 0 : i32
    %2 = arith.cmpi ne, %1, %c0_i32_0 : i32
    scf.if %2 {
      %c0_19 = arith.constant 0 : index
      %c0_20 = arith.constant 0 : index
      %39 = vector.load %arg1[%c0_19, %c0_20] : memref<16x256xf32, #tpu.memory_space<vmem>>, vector<16x256xf32>
      %c0_21 = arith.constant 0 : index
      %c0_22 = arith.constant 0 : index
      %40 = vector.load %arg4[%c0_21, %c0_22] : memref<16x256xf32, #tpu.memory_space<vmem>>, vector<16x256xf32>
      tpu.vector_store %arg4[%c0_21, %c0_22], %39 {strides = array<i32>} : memref<16x256xf32, #tpu.memory_space<vmem>>, vector<16x256xf32>,
    } else {
    }
    %c0 = arith.constant 0 : index
    %c0_1 = arith.constant 0 : index
    %3 = vector.load %arg4[%c0, %c0_1] : memref<16x256xf32, #tpu.memory_space<vmem>>, vector<16x256xf32>
    %4 = arith.truncf %3 : vector<16x256xf32> to vector<16x256xbf16>
    %c0_2 = arith.constant 0 : index
    %c0_3 = arith.constant 0 : index
    %c0_4 = arith.constant 0 : index
    %5 = vector.load %arg2[%c0_2, %c0_3, %c0_4] : memref<1x256x256xbf16, #tpu.memory_space<vmem>>, vector<1x256x256xbf16>
    %6 = vector.shape_cast %5 : vector<1x256x256xbf16> to vector<256x256xbf16>
    %cst = arith.constant dense<0.000000e+00> : vector<16x256xf32>
    %7 = tpu.matmul %4, %6, %cst {dimension_numbers = #tpu.dot_dimension_numbers<[1], [0], [0], [1], [0, 0, 1, 1], [], []>} : vector<16x256xbf16>, vector<256x256xbf16>, vector<16x256xf32> -> vector<16x256xf32>
    %cst_5 = arith.constant dense<0.000000e+00> : vector<256xf32>
    %8 = vector.multi_reduction <add>, %7, %cst_5 [0] : vector<16x256xf32> to vector<256xf32>
    %9 = vector.shape_cast %8 : vector<256xf32> to vector<1x256xf32>
    %cst_6 = arith.constant 1.600000e+01 : f32
    %10 = vector.broadcast %cst_6 : f32 to vector<1x256xf32>
    %11 = arith.divf %9, %10 : vector<1x256xf32>
    %12 = vector.broadcast %11 : vector<1x256xf32> to vector<16x256xf32>
    %13 = arith.subf %7, %12 : vector<16x256xf32>
    %14 = arith.mulf %13, %13 : vector<16x256xf32>
    %cst_7 = arith.constant dense<0.000000e+00> : vector<256xf32>
    %15 = vector.multi_reduction <add>, %14, %cst_7 [0] : vector<16x256xf32> to vector<256xf32>
    %16 = vector.shape_cast %15 : vector<256xf32> to vector<1x256xf32>
    %cst_8 = arith.constant 1.600000e+01 : f32
    %17 = vector.broadcast %cst_8 : f32 to vector<1x256xf32>
    %18 = arith.divf %16, %17 : vector<1x256xf32>
    %c0_9 = arith.constant 0 : index
    %c0_10 = arith.constant 0 : index
    %c0_11 = arith.constant 0 : index
    %19 = vector.load %arg3[%c0_9, %c0_10, %c0_11] : memref<1x8x256xf32, #tpu.memory_space<vmem>>, vector<1x1x256xf32>
    %20 = vector.shape_cast %19 : vector<1x1x256xf32> to vector<1x256xf32>
    %c0_12 = arith.constant 0 : index
    %c1 = arith.constant 1 : index
    %c0_13 = arith.constant 0 : index
    %21 = vector.load %arg3[%c0_12, %c1, %c0_13] : memref<1x8x256xf32, #tpu.memory_space<vmem>>, vector<1x1x256xf32>
    %22 = vector.shape_cast %21 : vector<1x1x256xf32> to vector<1x256xf32>
    %cst_14 = arith.constant 9.99999974E-6 : f32
    %23 = vector.broadcast %cst_14 : f32 to vector<1x256xf32>
    %24 = arith.addf %18, %23 : vector<1x256xf32>
    %25 = math.rsqrt %24 : vector<1x256xf32>
    %26 = arith.mulf %20, %25 : vector<1x256xf32>
    %27 = arith.mulf %11, %26 : vector<1x256xf32>
    %28 = arith.subf %22, %27 : vector<1x256xf32>
    %29 = vector.broadcast %26 : vector<1x256xf32> to vector<16x256xf32>
    %30 = arith.mulf %7, %29 : vector<16x256xf32>
    %31 = vector.broadcast %28 : vector<1x256xf32> to vector<16x256xf32>
    %32 = arith.addf %30, %31 : vector<16x256xf32>
    %cst_15 = arith.constant 0.000000e+00 : f32
    %33 = vector.broadcast %cst_15 : f32 to vector<16x256xf32>
    %34 = arith.cmpf oge, %32, %33 : vector<16x256xf32>
    %cst_16 = arith.constant 0.00999999977 : f32
    %35 = vector.broadcast %cst_16 : f32 to vector<16x256xf32>
    %36 = arith.mulf %35, %32 : vector<16x256xf32>
    %37 = arith.select %34, %32, %36 : vector<16x256xi1>, vector<16x256xf32>
    %c0_17 = arith.constant 0 : index
    %c0_18 = arith.constant 0 : index
    %38 = vector.load %arg4[%c0_17, %c0_18] : memref<16x256xf32, #tpu.memory_space<vmem>>, vector<16x256xf32>
    tpu.vector_store %arg4[%c0_17, %c0_18], %37 {strides = array<i32>} : memref<16x256xf32, #tpu.memory_space<vmem>>, vector<16x256xf32>,
    return
  }
  func.func @transform_0(%arg0: i32) -> (i32, i32) {
    %c0_i32 = arith.constant 0 : i32
    %c0_i32_0 = arith.constant 0 : i32
    %c0_i32_1 = arith.constant 0 : i32
    return %c0_i32, %c0_i32_0 : i32, i32
  }
  func.func @transform_1(%arg0: i32) -> (i32, i32, i32) {
    %c0_i32 = arith.constant 0 : i32
    %c0_i32_0 = arith.constant 0 : i32
    %c0_i32_1 = arith.constant 0 : i32
    return %arg0, %c0_i32, %c0_i32_0 : i32, i32, i32
  }
  func.func @transform_2(%arg0: i32) -> (i32, i32, i32) {
    %c0_i32 = arith.constant 0 : i32
    %c0_i32_0 = arith.constant 0 : i32
    %c0_i32_1 = arith.constant 0 : i32
    return %arg0, %c0_i32, %c0_i32_0 : i32, i32, i32
  }
  func.func @transform_3(%arg0: i32) -> (i32, i32) {
    %c0_i32 = arith.constant 0 : i32
    %c0_i32_0 = arith.constant 0 : i32
    %c0_i32_1 = arith.constant 0 : i32
    return %c0_i32, %c0_i32_0 : i32, i32
  }
}

</mosaic_0001>

<bundles_post_ra>
// kernel: linear_block_forward.1
= control target key start
LH: loop header
LB: loop body
LE: loop exit
PB: predicated region body
PF: predicated region fallthrough
CT: control target
= control target key end

     0   :  { %8 = vsyncpa [#allocation3], 0  ;;  %s1348_s0 = inlined_call_operand.hbm [shape: f32[16,256], index: 0, kind: input, shape index: {}]   ;;  %s1349_s1 = inlined_call_operand.hbm [shape: bf16[2,256,256], index: 1, kind: input, shape index: {}]   ;;  %s1350_s2 = inlined_call_operand.hbm [shape: f32[2,8,256], index: 2, kind: input, shape index: {}]   ;;  %s1351_s3 = inlined_call_operand.hbm [shape: f32[16,256], index: 3, kind: output, shape index: {}]  }
   0x1   :  { %9 = vsyncpa [#allocation6], 0 }
   0x2   :  { %11 = vsyncpa [#allocation6 + $0x1], 0 }
   0x3   :  { %12 = vsyncpa [#allocation4], 0  ;;  %s1069_s12 = smov 0   ;;  %s1071_s13 = smov 0  }
   0x4   :  { %s1073_s14 = smov 0   ;;  %s1075_s15 = smov 0  }
   0x5 LB: > { %s1090_s16 = sadd.s32 1, %s1036_s15   ;;  %s46_s17 = sadd.s32 1, %s1032_s14  ;;  %s1036_s15 = sphi %s1075_s15, %s1373_s15   ;;  %s1032_s14 = sphi %s1073_s14, %s1372_s14   ;;  %s1028_s13 = sphi %s1071_s13, %s1371_s13   ;;  %s1024_s12 = sphi %s1069_s12, %s1370_s12  }
   0x6   : > { %s43_s18 = ssub.s32 %s1036_s15, %s1090_s16  ;;  %p53_p0 = scmp.ne.s32.totalorder %s1032_s14, %s1028_s13 }
   0x7   : > { %p44_p1 = scmp.eq.s32.totalorder %s43_s18, 0  ;;  %p54_p2 = scmp.eq.s32.totalorder %s1036_s15, 0 }
   0x8   : > { %p783_p3 = scmp.lt.s32.totalorder %s1036_s15, 2  ;;  %s143_s20 = sand.u32 1, %s1036_s15  }
   0x9   : > { %s1100_s19 = scalar_select %p44_p1, %s1032_s14, %s46_s17  }
   0xa   : > { %p55_p4 = por %p54_p2, %p53_p0  ;;  %s145_s21 = sand.u32 1, %s1032_s14  }
   0xb   : > { %s709_s22 = sshll.u32 %s145_s21, 8  ;;  %s757_s23 = sshll.u32 %s1036_s15, 12 }
   0xc   : > { %s1110_s26 = scalar_lea.hbm %s1349_s1, %s757_s23  ;;  %s147_s27 = scalar_lea.vmem [#allocation5], %s709_s22 }
   0xd   : > { %s154_s28 = sshll.u32 %s147_s27, 4  ;;  %p1112_p5 = pnand %p783_p3, %p55_p4  ;;  %s1116_s28 = int_to_ptr.vmem [resolvable:$true] %s154_s28 }
   0xe   : > { %s1118_s30 = scalar_lea.sflag [#allocation6], %s143_s20  ;;  %s880_s4 = scalar_lea.hbm %s1110_s26, 4096 }
   0xf   : > { %s1358_s29 = scalar_select %p1112_p5, 1, 0 }
  0x10   : > { %p881_p6 = scmp.ne.s32.totalorder %s1110_s26, %s880_s4  ;;  %p1353_p7 = pneg %p1112_p5 }
  0x11   : > { %s885_s7 = scalar_lea.hbm %s1349_s1, 8192  ;;  %p886_p10 = scmp.lt.u32.totalorder %s1110_s26, %s1349_s1 }
  0x12   : > { %p883_p8 = pnand %p1353_p7, %p881_p6  ;;  %p887_p11 = scmp.lt.u32.totalorder %s885_s7, %s880_s4 }
  0x13   : > { %p889_p13 = scmp.lt.u32.totalorder %s880_s4, %s1110_s26 }
  0x14   : > { %p884_p9 = pneg %p883_p8  ;;  %p888_p12 = por %p887_p11, %p886_p10 }
  0x16   : > { %p890_p0 = por %p889_p13, %p888_p12 }
  0x18   : > { %p891_p1 = pnand %p890_p0, %p884_p9 }
  0x1a   : > { %894 = shalt.err (!%p891_p1)
}
  0x1b   : > { %s895_s10 = scalar_lea.vmem %s1116_s28, 4096  ;;  %s1038_s11 = smov [#allocation5]  }
  0x1c   : > { %p896_p2 = scmp.ne.s32.totalorder %s1116_s28, %s895_s10  ;;  %s900_s17 = sshll.u32 %s1038_s11, 4  ;;  %s901_s17 = int_to_ptr.vmem [resolvable:$false] %s900_s17 }
  0x1d   : > { %s902_s18 = scalar_lea.vmem %s901_s17, 8192  ;;  %p903_p6 = scmp.lt.s32.totalorder %s1116_s28, %s901_s17 }
  0x1e   : > { %p898_p3 = pnand %p896_p2, %p1353_p7  ;;  %p904_p8 = scmp.lt.s32.totalorder %s902_s18, %s895_s10 }
  0x20   : > { %p899_p4 = pneg %p898_p3  ;;  %p905_p10 = por %p904_p8, %p903_p6 }
  0x22   : > { %p906_p11 = pnand %p905_p10, %p899_p4 }
  0x24   : > { %909 = shalt.err (!%p906_p11)
}
  0x25   : > { %s1039_s20 = smov 128   ;;  %s1040_s22 = smov 8  }
  0x26   : > { %778 = dma.hbm_to_vmem [thread:$0]  (!%p1112_p5), %s1110_s26, 4096, %s1116_s28, %s1118_s30, %s1039_s20, %s1039_s20, %s1040_s22  }
  0x27   : > { %s1147_s23 = sadd.s32 4294967295, %s1036_s15   ;;  %p59_p12 = scmp.ne.s32.totalorder %s1028_s13, %s1024_s12 }
  0x28   : > { %p1352_p9 = scmp.eq.s32.totalorder %s1147_s23, 0  ;;  %p706_p13 = scmp.ge.s32.totalorder %s1036_s15, 1 }
  0x29   : > { %p117_p0 = scmp.lt.s32.totalorder %s1036_s15, 3  ;;  %s1041_s26 = smov [#allocation2]  }
  0x2a   : > { %p1157_p2 = por %p1352_p9, %p59_p12  ;;  %s129_s27 = sshll.u32 %s1041_s26, 4  ;;  %s1165_s27 = int_to_ptr.vmem [resolvable:$true] %s129_s27 }
  0x2b   : > { %p1161_p3 = pnand %p706_p13, %p117_p0  ;;  %s712_s12 = sshll.u32 %s145_s21, 4 }
  0x2c   : > { %s1359_s24 = scalar_select %p1157_p2, 1, 0 }
  0x2d   : > { %s1360_s25 = scalar_select %p1161_p3, 1, 0 }
  0x2e   : > { %p771_p4 = pneg %p1161_p3  ;;  %s758_s28 = sshll.u32 %s1036_s15, 8 }
  0x2f   : > { %s1181_s7 = scalar_lea.hbm %s1350_s2, %s758_s28  ;;  %s168_s8 = scalar_lea.vmem [#allocation7], %s712_s12 }
  0x30   : > { %p1174_p6 = pnand %p771_p4, %p1352_p9  ;;  %s176_s9 = sshll.u32 %s168_s8, 4  ;;  %s1183_s9 = int_to_ptr.vmem [resolvable:$true] %s176_s9 }
  0x31   : > { %s910_s21 = scalar_lea.hbm %s1348_s0, 512 }
  0x32   : > { %p911_p8 = scmp.ne.s32.totalorder %s1348_s0, %s910_s21  ;;  %p912_p10 = pneg %p1174_p6 }
  0x33   : > { %p917_p13 = scmp.lt.u32.totalorder %s910_s21, %s1348_s0 }
  0x34   : > { %p913_p11 = pnand %p912_p10, %p911_p8 }
  0x36   : > { %p914_p12 = pneg %p913_p11 }
  0x38   : > { %p919_p0 = pnand %p917_p13, %p914_p12 }
  0x3a   : > { %922 = shalt.err (!%p919_p0)
}
  0x3b   : > { %s923_s22 = scalar_lea.vmem %s1165_s27, 512  ;;  %p931_p7 = scmp.lt.s32.totalorder %s1165_s27, %s1165_s27 }
  0x3c   : > { %p924_p4 = scmp.ne.s32.totalorder %s1165_s27, %s923_s22  ;;  %p932_p2 = scmp.lt.s32.totalorder %s923_s22, %s923_s22 }
  0x3e   : > { %p926_p1 = pnand %p924_p4, %p912_p10  ;;  %p933_p3 = por %p932_p2, %p931_p7 }
  0x40   : > { %p927_p9 = pneg %p926_p1 }
  0x42   : > { %p934_p5 = pnand %p933_p3, %p927_p9 }
  0x44   : > { %937 = shalt.err (!%p934_p5)
}
  0x45   : > { %s1042_s26 = smov 256   ;;  %s1043_s12 = smov 16  }
  0x46   : > { %774 = dma.hbm_to_vmem [thread:$0]  (!%p1174_p6), %s1348_s0, 512, %s1165_s27, [#allocation3], %s1042_s26, %s1042_s26, %s1043_s12  }
  0x47   : > { %s938_s6 = scalar_lea.hbm %s1181_s7, 256  ;;  %p1362_p8 = scmp.ne.s32.totalorder %s1358_s29, 0 }
  0x48   : > { %p939_p1 = scmp.ne.s32.totalorder %s1181_s7, %s938_s6  ;;  %s943_s11 = scalar_lea.hbm %s1350_s2, 512 }
  0x49   : > { %p1363_p7 = pneg %p1362_p8  ;;  %p944_p2 = scmp.lt.u32.totalorder %s1181_s7, %s1350_s2 }
  0x4a   : > { %p945_p3 = scmp.lt.u32.totalorder %s943_s11, %s938_s6  ;;  %p947_p11 = scmp.lt.u32.totalorder %s938_s6, %s1181_s7 }
  0x4b   : > { %p941_p9 = pnand %p939_p1, %p1363_p7 }
  0x4c   : > { %p946_p10 = por %p945_p3, %p944_p2 }
  0x4d   : > { %p942_p5 = pneg %p941_p9 }
  0x4e   : > { %p948_p12 = por %p947_p11, %p946_p10 }
  0x50   : > { %p949_p13 = pnand %p948_p12, %p942_p5 }
  0x52   : > { %952 = shalt.err (!%p949_p13)
}
  0x53   : > { %s953_s27 = scalar_lea.vmem %s1183_s9, 256  ;;  %p1364_p0 = pmov %p1363_p7 }
  0x54   : > { %p954_p6 = scmp.ne.s32.totalorder %s1183_s9, %s953_s27  ;;  %s1044_s4 = smov [#allocation7]  }
  0x55   : > { %s958_s17 = sshll.u32 %s1044_s4, 4  ;;  %s959_s17 = int_to_ptr.vmem [resolvable:$false] %s958_s17 }
  0x56   : > { %p956_p4 = pnand %p954_p6, %p1364_p0  ;;  %s960_s18 = scalar_lea.vmem %s959_s17, 512 }
  0x57   : > { %p961_p7 = scmp.lt.s32.totalorder %s1183_s9, %s959_s17  ;;  %p962_p9 = scmp.lt.s32.totalorder %s960_s18, %s953_s27 }
  0x58   : > { %p957_p1 = pneg %p956_p4 }
  0x59   : > { %p963_p2 = por %p962_p9, %p961_p7 }
  0x5b   : > { %p964_p3 = pnand %p963_p2, %p957_p1 }
  0x5d   : > { %967 = shalt.err (!%p964_p3)
}
  0x5e   : > { %781 = dma.hbm_to_vmem [thread:$0]  (!%p1362_p8), %s1181_s7, 256, %s1183_s9, %s1118_s30  }
  0x5f   : > { %p1365_p5 = scmp.ne.s32.totalorder %s1360_s25, 0 }
  0x60   : > { %p1366_p10 = scmp.eq.s32.totalorder (!%p1365_p5), %s1147_s23, 0 }
  0x61   : > { %185 = sbr.rel (%p1365_p5) target bundleno = 493 (0x1ed), region = 32 }
  0x68   : > { %1011 = dma.done.wait (%p1366_p10), [#allocation3], 512   ;;  %p1367_p11 = pmov %p1366_p10 }
  0x69   : > { %s191_s20 = sand.u32 1, %s1147_s23   ;;  %s193_s22 = sand.u32 1, %s1028_s13  }
  0x6a   : > { %1013 = vsyncadd (%p1367_p11), [#allocation3], 4294966784  ;;  %s717_s26 = sshll.u32 %s193_s22, 8  ;;  %s192_s29 = scalar_lea.sflag [#allocation6], %s191_s20 }
  0x6b   : > { %s1238_s12 = scalar_lea.vmem [#allocation5], %s717_s26  ;;  %p1368_p12 = scmp.ne.s32.totalorder %s1359_s24, 0 }
  0x6d   : > { %1015 = dma.done.wait (%p1368_p12), %s192_s29, 4352  }
  0x6e   : > { %1017 = vsyncadd (%p1368_p12), %s192_s29, 4294962944  ;;  %s1244_s30 = sshll.u32 %s193_s22, 4  ;;  %p1369_p8 = scmp.ne.s32.totalorder %s1147_s23, 0 }
  0x6f   : > { %s204_s25 = scalar_lea.vmem [#allocation7], %s1244_s30  ;;  %v231_v0 = vld [vmem:[#allocation2] sm:$0xff] (!%p1369_p8)  ;;  %v232_v1 = vld [vmem:[#allocation2 + $0x8] sm:$0xff] (!%p1369_p8)  ;;  %v233_v2 = vld [vmem:[#allocation2 + $0x10] sm:$0xff] (!%p1369_p8) }
  0x70   : > { %230 = sbr.rel (%p1369_p8) target bundleno = 119 (0x77), region = 48  ;;  %235 = vst [vmem:[#allocation8] sm:$0xff] (!%p1369_p8), %v231_v0  ;;  %236 = vst [vmem:[#allocation8 + $0x8] sm:$0xff] (!%p1369_p8), %v232_v1  ;;  %v234_v3 = vld [vmem:[#allocation2 + $0x18] sm:$0xff] (!%p1369_p8) }
  0x71   : > { %237 = vst [vmem:[#allocation8 + $0x10] sm:$0xff] (!%p1369_p8), %v233_v2  ;;  %238 = vst [vmem:[#allocation8 + $0x18] sm:$0xff] (!%p1369_p8), %v234_v3 }
  0x77 PF: > { %v828_v4 = vld [vmem:[%s1238_s12 + $0x4] ss:$8 sps:$4 sm:$0xff]   ;;  %v830_v5 = vld [vmem:[%s1238_s12] ss:$8 sps:$4 sm:$0xff]   ;;  %v831_v6 = vld [vmem:[%s1238_s12 + $0x14] ss:$8 sps:$4 sm:$0xff]  }
  0x78   : > { %437 = vmatprep.subr.bf16.mxu0 %v828_v4  ;;  %v833_v7 = vld [vmem:[%s1238_s12 + $0x10] ss:$8 sps:$4 sm:$0xff]   ;;  %v834_v8 = vld [vmem:[%s1238_s12 + $0x24] ss:$8 sps:$4 sm:$0xff]   ;;  %v836_v9 = vld [vmem:[%s1238_s12 + $0x20] ss:$8 sps:$4 sm:$0xff]  }
  0x79   : > { %438 = vmatpush1.bf16.msra.mxu0 %v830_v5  ;;  %v837_v10 = vld [vmem:[%s1238_s12 + $0x34] ss:$8 sps:$4 sm:$0xff]   ;;  %v839_v11 = vld [vmem:[%s1238_s12 + $0x30] ss:$8 sps:$4 sm:$0xff]   ;;  %v840_v12 = vld [vmem:[%s1238_s12 + $0x44] ss:$8 sps:$4 sm:$0xff]  }
  0x7a   : > { %439 = vmatprep.subr.bf16.mxu0 %v831_v6  ;;  %v842_v13 = vld [vmem:[%s1238_s12 + $0x40] ss:$8 sps:$4 sm:$0xff]   ;;  %v843_v14 = vld [vmem:[%s1238_s12 + $0x54] ss:$8 sps:$4 sm:$0xff]   ;;  %v845_v15 = vld [vmem:[%s1238_s12 + $0x50] ss:$8 sps:$4 sm:$0xff]  }
  0x7b   : > { %v846_v16 = vld [vmem:[%s1238_s12 + $0x64] ss:$8 sps:$4 sm:$0xff]   ;;  %v242_v18 = vld [vmem:[#allocation8 + $0x18] sm:$0xff]  ;;  %v848_v20 = vld [vmem:[%s1238_s12 + $0x60] ss:$8 sps:$4 sm:$0xff]   ;;  %s1046_s24 = smov [#allocation8]  }
  0x7c   : > { %v240_v17 = vld [vmem:[#allocation8 + $0x8] sm:$0xff]  ;;  %v849_v21 = vld [vmem:[%s1238_s12 + $0x74] ss:$8 sps:$4 sm:$0xff]   ;;  %v851_v22 = vld [vmem:[%s1238_s12 + $0x70] ss:$8 sps:$4 sm:$0xff]   ;;  %s620_s7 = sshll.u32 %s1046_s24, 4  ;;  %s1306_s7 = int_to_ptr.vmem [resolvable:$true] %s620_s7 }
  0x7d   : > { %440 = vmatpush1.bf16.msra.mxu0 %v833_v7  ;;  %v244_v19 = vpack.c.bf16 %v242_v18, %v240_v17  ;;  %v852_v23 = vld [vmem:[%s1238_s12 + $0x84] ss:$8 sps:$4 sm:$0xff]   ;;  %v854_v24 = vld [vmem:[%s1238_s12 + $0x80] ss:$8 sps:$4 sm:$0xff]   ;;  %v855_v25 = vld [vmem:[%s1238_s12 + $0x94] ss:$8 sps:$4 sm:$0xff]   ;;  %p975_p1 = scmp.lt.s32.totalorder %s1306_s7, %s1306_s7 }
  0x7e   : > { %441 = vmatprep.subr.bf16.mxu0 %v834_v8  ;;  %v857_v26 = vld [vmem:[%s1238_s12 + $0x90] ss:$8 sps:$4 sm:$0xff]   ;;  %v858_v27 = vld [vmem:[%s1238_s12 + $0xa4] ss:$8 sps:$4 sm:$0xff]   ;;  %v860_v28 = vld [vmem:[%s1238_s12 + $0xa0] ss:$8 sps:$4 sm:$0xff]  }
  0x7f   : > { %469 = vmatprep.mubr.bf16.mxu0 %v244_v19  ;;  %v861_v29 = vld [vmem:[%s1238_s12 + $0xb4] ss:$8 sps:$4 sm:$0xff]   ;;  %v863_v30 = vld [vmem:[%s1238_s12 + $0xb0] ss:$8 sps:$4 sm:$0xff]   ;;  %v864_v31 = vld [vmem:[%s1238_s12 + $0xc4] ss:$8 sps:$4 sm:$0xff]  }
  0x80   : > { %v866_v32 = vld [vmem:[%s1238_s12 + $0xc0] ss:$8 sps:$4 sm:$0xff]   ;;  %v867_v33 = vld [vmem:[%s1238_s12 + $0xd4] ss:$8 sps:$4 sm:$0xff]   ;;  %v869_v34 = vld [vmem:[%s1238_s12 + $0xd0] ss:$8 sps:$4 sm:$0xff]  }
  0x81   : > { %442 = vmatpush1.bf16.msra.mxu0 %v836_v9  ;;  %v870_v35 = vld [vmem:[%s1238_s12 + $0xe4] ss:$8 sps:$4 sm:$0xff]   ;;  %v872_v36 = vld [vmem:[%s1238_s12 + $0xe0] ss:$8 sps:$4 sm:$0xff]   ;;  %v873_v37 = vld [vmem:[%s1238_s12 + $0xf4] ss:$8 sps:$4 sm:$0xff]  }
  0x82   : > { %443 = vmatprep.subr.bf16.mxu0 %v837_v10  ;;  %v875_v38 = vld [vmem:[%s1238_s12 + $0xf0] ss:$8 sps:$4 sm:$0xff]   ;;  %v239_v39 = vld [vmem:[#allocation8] sm:$0xff]  ;;  %p785_p13 = scmp.eq.s32.totalorder %s1147_s23, 1  ;;  %s968_s9 = scalar_lea.vmem %s1306_s7, 512 }
  0x83   : > { %v241_v40 = vld [vmem:[#allocation8 + $0x10] sm:$0xff]  ;;  %p969_p6 = scmp.ne.s32.totalorder %s1306_s7, %s968_s9  ;;  %p976_p7 = scmp.lt.s32.totalorder %s968_s9, %s968_s9 }
  0x84   : > { %v243_v41 = vpack.c.bf16 %v241_v40, %v239_v39 }
  0x85   : > { %444 = vmatpush1.bf16.msra.mxu0 %v839_v11  ;;  %p970_p0 = pnand %p969_p6, %p785_p13  ;;  %p977_p9 = por %p976_p7, %p975_p1 }
  0x86   : > { %445 = vmatprep.subr.bf16.mxu0 %v840_v12 }
  0x87   : > { %p971_p4 = pneg %p970_p0 }
  0x89   : > { %446 = vmatpush1.bf16.msra.mxu0 %v842_v13  ;;  %p978_p2 = pnand %p977_p9, %p971_p4 }
  0x8a   : > { %447 = vmatprep.subr.bf16.mxu0 %v843_v14 }
  0x8d   : > { %448 = vmatpush1.bf16.msra.mxu0 %v845_v15 }
  0x8e   : > { %449 = vmatprep.subr.bf16.mxu0 %v846_v16 }
  0x91   : > { %450 = vmatpush1.bf16.msra.mxu0 %v848_v20 }
  0x92   : > { %451 = vmatprep.subr.bf16.mxu0 %v849_v21 }
  0x95   : > { %452 = vmatpush1.bf16.msra.mxu0 %v851_v22 }
  0x96   : > { %453 = vmatprep.subr.bf16.mxu0 %v852_v23 }
  0x99   : > { %454 = vmatpush1.bf16.msra.mxu0 %v854_v24  ;;  %v1045_v24 = vmov 1966171168  }
  0x9a   : > { %455 = vmatprep.subr.bf16.mxu0 %v855_v25  ;;  %v532_v25 = vunpack.c.l.s4 %v1045_v24 }
  0x9d   : > { %456 = vmatpush1.bf16.msra.mxu0 %v857_v26  ;;  %v534_v26 = vlaneseq }
  0x9e   : > { %457 = vmatprep.subr.bf16.mxu0 %v858_v27  ;;  %v533_v27 = vunpack.c.0.s8 %v532_v25 }
  0xa1   : > { %458 = vmatpush1.bf16.msra.mxu0 %v860_v28  ;;  %v535_v28 = vshrl.u32 %v534_v26, 7 }
  0xa2   : > { %459 = vmatprep.subr.bf16.mxu0 %v861_v29 }
  0xa5   : > { %460 = vmatpush1.bf16.msra.mxu0 %v863_v30  ;;  %v536_v30 = vsub.s32 %v533_v27, %v535_v28 }
  0xa6   : > { %461 = vmatprep.subr.bf16.mxu0 %v864_v31 }
  0xa9   : > { %462 = vmatpush1.bf16.msra.mxu0 %v866_v32 }
  0xaa   : > { %463 = vmatprep.subr.bf16.mxu0 %v867_v33 }
  0xad   : > { %464 = vmatpush1.bf16.msra.mxu0 %v869_v34  ;;  %v521_v34 = vld [vmem:[%s204_s25] ss:$8 sm:$0x3] }
  0xae   : > { %465 = vmatprep.subr.bf16.mxu0 %v870_v35 }
  0xb1   : > { %466 = vmatpush1.bf16.msra.mxu0 %v872_v36  ;;  %v550_v36 = vsub.s32 0, %v535_v28 }
  0xb2   : > { %467 = vmatprep.subr.bf16.mxu0 %v873_v37  ;;  %v554_v37 = vsub.s32 1, %v535_v28 }
  0xb5   : > { %468 = vmatpush1.bf16.msra.mxu0 %v875_v38 }
  0xb8   : > { %470 = vmatmul.mubr.bf16.vlgmr.msra.gmra.mrb[0].mxu0 %v243_v41 }
 0x18b   : > { %v1281_v42 = vpop.f32.mrb[0].mxu0 }
 0x18c   : > { %v1283_v43 = vpop.f32.mrb[1].mxu0 }
 0x18d   : > { %v1285_v44 = vpop.f32.mrb[2].mxu0 }
 0x18e   : > { %v480_v45 = vadd.f32 %v1285_v44, %v1281_v42  ;;  %v1289_v46 = vpop.f32.mrb[3].mxu0 }
 0x18f   : > { %v487_v47 = vadd.f32 %v1289_v46, %v1283_v43 }
 0x190   : > { %v481_v48 = vrot.slane %v480_v45, 4 }
 0x191   : > { %v488_v49 = vrot.slane %v487_v47, 4 }
 0x192   : > { %v482_v50 = vadd.f32 %v481_v48, %v480_v45 }
 0x193   : > { %v489_v51 = vadd.f32 %v488_v49, %v487_v47 }
 0x194   : > { %v483_v52 = vrot.slane %v482_v50, 2 }
 0x195   : > { %v490_v53 = vrot.slane %v489_v51, 2 }
 0x196   : > { %v484_v54 = vadd.f32 %v483_v52, %v482_v50 }
 0x197   : > { %v491_v55 = vadd.f32 %v490_v53, %v489_v51  ;;  %v752_v53 = vld [vmem:[%s204_s25 + $0x1] ss:$8 sm:$0x3] }
 0x198   : > { %v485_v56 = vrot.slane %v484_v54, 1 }
 0x199   : > { %v492_v57 = vrot.slane %v491_v55, 1 }
 0x19a   : > { %v486_v58 = vadd.f32 %v485_v56, %v484_v54 }
 0x19b   : > { %v493_v59 = vadd.f32 %v492_v57, %v491_v55 }
 0x19c   : > { %v495_v60 = vmul.f32 0.0625, %v486_v58 }
 0x19d   : > { %v496_v61 = vmul.f32 0.0625, %v493_v59 }
 0x19e   : > { %v497_v62 = vsub.f32 %v1281_v42, %v495_v60  ;;  %v499_v63 = vsub.f32 %v1285_v44, %v495_v60 }
 0x19f   : > { %v498_v0 = vsub.f32 %v1283_v43, %v496_v61  ;;  %v500_v1 = vsub.f32 %v1289_v46, %v496_v61 }
 0x1a0   : > { %v501_v2 = vmul.f32 %v497_v62, %v497_v62  ;;  %v503_v3 = vmul.f32 %v499_v63, %v499_v63 }
 0x1a1   : > { %v502_v4 = vmul.f32 %v498_v0, %v498_v0  ;;  %v504_v5 = vmul.f32 %v500_v1, %v500_v1 }
 0x1a2   : > { %v505_v6 = vadd.f32 %v503_v3, %v501_v2 }
 0x1a3   : > { %v512_v7 = vadd.f32 %v504_v5, %v502_v4 }
 0x1a4   : > { %v506_v8 = vrot.slane %v505_v6, 4 }
 0x1a5   : > { %v513_v9 = vrot.slane %v512_v7, 4 }
 0x1a6   : > { %v507_v10 = vadd.f32 %v506_v8, %v505_v6 }
 0x1a7   : > { %v514_v11 = vadd.f32 %v513_v9, %v512_v7 }
 0x1a8   : > { %v508_v12 = vrot.slane %v507_v10, 2 }
 0x1a9   : > { %v515_v13 = vrot.slane %v514_v11, 2 }
 0x1aa   : > { %v509_v14 = vadd.f32 %v508_v12, %v507_v10 }
 0x1ab   : > { %v516_v15 = vadd.f32 %v515_v13, %v514_v11 }
 0x1ac   : > { %v510_v16 = vrot.slane %v509_v14, 1 }
 0x1ad   : > { %v517_v17 = vrot.slane %v516_v15, 1 }
 0x1ae   : > { %v511_v18 = vadd.f32 %v510_v16, %v509_v14 }
 0x1af   : > { %v518_v19 = vadd.f32 %v517_v17, %v516_v15 }
 0x1b0   : > { %v519_v20 = vmul.f32 0.0625, %v511_v18 }
 0x1b1   : > { %v520_v21 = vmul.f32 0.0625, %v518_v19 }
 0x1b2   : > { %v524_v22 = vadd.f32 1e-05, %v519_v20 }
 0x1b3   : > { %v525_v23 = vadd.f32 1e-05, %v520_v21 }
 0x1b4   : > { %876 = vrsqrt.f32 %v524_v22 }
 0x1b5   : > { %878 = vrsqrt.f32 %v525_v23 }
 0x1be   : > { %v877_v29 = vpop.eup %876 }
 0x1bf   : > { %v879_v31 = vpop.eup %878 }
 0x1c0   : > { %v530_v32 = vcombine.low %v877_v29, %v879_v31 }
 0x1c2   : > { %v537_v33 = vrot.slane %v530_v32, %v536_v30 }
 0x1c4   : > { %v544_v35 = vrot.slane %v537_v33, %v536_v30 }
 0x1c6   : > { %v546_v38 = vmul.f32 %v544_v35, %v521_v34 }
 0x1c8   : > { %v551_v39 = vrot.slane %v546_v38, %v550_v36  ;;  %v555_v40 = vrot.slane %v546_v38, %v554_v37 }
 0x1ca   : > { %v558_v41 = vmul.f32 %v551_v39, %v495_v60  ;;  %v559_v45 = vmul.f32 %v555_v40, %v496_v61  ;;  %v579_v47 = vmul.f32 %v551_v39, %v1281_v42  ;;  %v580_v48 = vmul.f32 %v555_v40, %v1283_v43 }
 0x1cb   : > { %v581_v49 = vmul.f32 %v551_v39, %v1285_v44  ;;  %v582_v50 = vmul.f32 %v555_v40, %v1289_v46 }
 0x1cc   : > { %v562_v51 = vcombine.low %v558_v41, %v559_v45 }
 0x1ce   : > { %v569_v52 = vrot.slane %v562_v51, %v536_v30 }
 0x1d0   : > { %v576_v54 = vrot.slane %v569_v52, %v536_v30 }
 0x1d2   : > { %v578_v55 = vsub.f32 %v752_v53, %v576_v54 }
 0x1d4   : > { %v587_v56 = vrot.slane %v578_v55, %v550_v36  ;;  %v591_v57 = vrot.slane %v578_v55, %v554_v37 }
 0x1d6   : > { %v594_v58 = vadd.f32 %v587_v56, %v579_v47  ;;  %v595_v59 = vadd.f32 %v591_v57, %v580_v48  ;;  %v596_v60 = vadd.f32 %v587_v56, %v581_v49  ;;  %v597_v61 = vadd.f32 %v591_v57, %v582_v50 }
 0x1d8   : > { %vm598_vm0 = vcmp.ge.f32.partialorder %v594_v58, 0.0  ;;  %vm599_vm1 = vcmp.ge.f32.partialorder %v595_v59, 0.0  ;;  %vm600_vm2 = vcmp.ge.f32.partialorder %v596_v60, 0.0  ;;  %vm601_vm3 = vcmp.ge.f32.partialorder %v597_v61, 0.0 }
 0x1d9   : > { %v602_v42 = vmul.f32 0.01, %v594_v58  ;;  %v603_v43 = vmul.f32 0.01, %v595_v59  ;;  %v604_v44 = vmul.f32 0.01, %v596_v60 }
 0x1da   : > { %v605_v46 = vmul.f32 0.01, %v597_v61 }
 0x1db   : > { %v606_v62 = vsel %vm598_vm0, %v594_v58, %v602_v42  ;;  %v607_v63 = vsel %vm599_vm1, %v595_v59, %v603_v43  ;;  %v608_v0 = vsel %vm600_vm2, %v596_v60, %v604_v44 }
 0x1dc   : > { %v609_v1 = vsel %vm601_vm3, %v597_v61, %v605_v46  ;;  %611 = vst [vmem:[#allocation8 + $0x8] sm:$0xff] %v607_v63  ;;  %610 = vst [vmem:[#allocation8] sm:$0xff] %v606_v62 }
 0x1dd   : > { %612 = vst [vmem:[#allocation8 + $0x10] sm:$0xff] %v608_v0  ;;  %613 = vst [vmem:[#allocation8 + $0x18] sm:$0xff] %v609_v1 }
 0x1de   : > { %981 = shalt.err (!%p978_p2)
}
 0x1df   : > { %s982_s6 = scalar_lea.hbm %s1351_s3, 512 }
 0x1e0   : > { %p983_p3 = scmp.ne.s32.totalorder %s1351_s3, %s982_s6  ;;  %p988_p11 = scmp.lt.u32.totalorder %s982_s6, %s1351_s3 }
 0x1e2   : > { %p984_p5 = pnand %p983_p3, %p785_p13 }
 0x1e4   : > { %p985_p10 = pneg %p984_p5 }
 0x1e6   : > { %p990_p12 = pnand %p988_p11, %p985_p10 }
 0x1e8   : > { %993 = shalt.err (!%p990_p12)
}
 0x1e9   : > { %s1047_s15 = smov 256   ;;  %s1048_s27 = smov 16  }
 0x1ea   : > { %768 = dma.vmem_to_hbm [thread:$0]  (%p785_p13), %s1306_s7, 512, %s1351_s3, [#allocation4], %s1047_s15, %s1047_s15, %s1048_s27  }
 0x1eb   : > { %1019 = dma.done.wait (%p785_p13), [#allocation4], 512  }
 0x1ec   : > { %1021 = vsyncadd (%p785_p13), [#allocation4], 4294966784 }
 0x1ed PF: > { %p15_p8 = scmp.ge.s32.totalorder %s1090_s16, 4   ;;  %s1370_s12 = smov %s1028_s13 }
 0x1ee   : > { %s1371_s13 = smov %s1032_s14  ;;  %s1372_s14 = smov %s1100_s19 }
 0x1ef   : > { %s1373_s15 = smov %s1090_s16  ;;  %17 = sbr.rel (!%p15_p8) target bundleno = 5 (0x5), region = 90 }
 0x1f6   :  { %636 = vsyncpa [#allocation3], 1 }
 0x1f7   :  { %638 = vsyncpa [#allocation3 + $0x1], 1 }
 0x1f8   :  { %639 = vsyncpa [#allocation6], 1 }
 0x1f9   :  { %641 = vsyncpa [#allocation6 + $0x1], 1 }
 0x1fa   :  { %642 = vsyncpa [#allocation4], 1 }
 0x1fb   :  { %644 = vsyncpa [#allocation4 + $0x1], 1 }

</bundles_post_ra>
